<compile_context>
chip_gen: v5e
topology: v5e:2x2
jax: 0.10.0
libtpu: 0.0.40
codegen_flags: <defaults>
</compile_context>

<pallas_src>
import functools

import jax
import jax.numpy as jnp
from jax.experimental import pallas as pl
from jax.experimental.pallas import tpu as pltpu

INPUT_MIN = -100.0
INPUT_MAX = 200.0

SUBLANE = 8  # sublane width (second-to-last-dim alignment for tiled batch blocks)


def _round_up(n: int, m: int) -> int:
    return ((n + m - 1) // m) * m


def policy_net_kernel(x_ref, w1_ref, b1_ref, w2_ref, b2_ref, out_ref):
    # fc1 + ReLU. Input normalization is already folded into w1/b1.
    h = jnp.dot(x_ref[...], w1_ref[...], preferred_element_type=jnp.float32) + b1_ref[...]
    h = jnp.maximum(h, 0.0)

    # fc2 (real action width A, no padded lanes).
    logits = jnp.dot(h, w2_ref[...], preferred_element_type=jnp.float32) + b2_ref[...]

    # Numerically stable log_softmax along the lane dim.
    m = jnp.max(logits, axis=-1, keepdims=True)
    shifted = logits - m
    lse = jnp.log(jnp.sum(jnp.exp(shifted), axis=-1, keepdims=True))
    out_ref[...] = (shifted - lse).astype(out_ref.dtype)


def prepare_params(w1, b1, w2, b2):
    """One-time parameter transform: fold (x - min)/range normalization into fc1."""
    w1 = jnp.asarray(w1, jnp.float32)
    b1 = jnp.asarray(b1, jnp.float32).reshape(1, -1)
    w2 = jnp.asarray(w2, jnp.float32)
    b2 = jnp.asarray(b2, jnp.float32).reshape(1, -1)

    # (x - min)/range @ W1 + b1  ==  x @ (W1/range) + (b1 - (min/range) * colsum(W1))
    inv_range = 1.0 / (INPUT_MAX - INPUT_MIN)
    w1f = w1 * inv_range
    b1f = b1 - (INPUT_MIN * inv_range) * jnp.sum(w1, axis=0, keepdims=True)
    return w1f, b1f, w2, b2


@functools.partial(jax.jit, static_argnames=("tile_b",))
def policy_network_forward(x, w1p, b1p, w2p, b2p, *, tile_b=1024):
    """x: (B, input_size) float32. Returns log-probs (B, num_actions) float32."""
    B, K = x.shape
    _, H = w1p.shape
    A = w2p.shape[1]
    x = x.astype(jnp.float32)

    if B <= tile_b:
        # Single grid step; block == full array dims, so no batch padding at all.
        tb = B
    else:
        # Near-equal, sublane-aligned tiles so the last tile isn't mostly padding;
        # Pallas handles the (possibly partial) final block.
        n_tiles = pl.cdiv(B, tile_b)
        tb = _round_up(pl.cdiv(B, n_tiles), SUBLANE)
    grid = (pl.cdiv(B, tb),)

    return pl.pallas_call(
        policy_net_kernel,
        out_shape=jax.ShapeDtypeStruct((B, A), jnp.float32),
        grid=grid,
        in_specs=[
            pl.BlockSpec((tb, K), lambda i: (i, 0)),   # x: streamed over batch tiles
            pl.BlockSpec((K, H), lambda i: (0, 0)),    # W1 (norm folded): resident
            pl.BlockSpec((1, H), lambda i: (0, 0)),    # b1 (norm folded): resident
            pl.BlockSpec((H, A), lambda i: (0, 0)),    # W2: resident
            pl.BlockSpec((1, A), lambda i: (0, 0)),    # b2: resident
        ],
        out_specs=pl.BlockSpec((tb, A), lambda i: (i, 0)),
        compiler_params=pltpu.CompilerParams(
            dimension_semantics=("parallel",),  # batch tiles are independent
        ),
    )(x, w1p, b1p, w2p, b2p)


if __name__ == "__main__":
    # Small shapes consistent with the module's forward.
    batch = 2
    input_size = 16
    hidden_size = 32
    num_actions = 8

    key = jax.random.PRNGKey(0)
    kx, kw1, kb1, kw2, kb2 = jax.random.split(key, 5)

    x = jax.random.uniform(kx, (batch, input_size), jnp.float32,
                           minval=-100.0, maxval=200.0)
    lim1 = 1.0 / (input_size ** 0.5)
    w1 = jax.random.uniform(kw1, (input_size, hidden_size), jnp.float32, -lim1, lim1)
    b1 = jax.random.uniform(kb1, (1, hidden_size), jnp.float32, -lim1, lim1)
    lim2 = 1.0 / (hidden_size ** 0.5)
    w2 = jax.random.uniform(kw2, (hidden_size, num_actions), jnp.float32, -lim2, lim2)
    b2 = jax.random.uniform(kb2, (1, num_actions), jnp.float32, -lim2, lim2)

    # One-time parameter prep (normalization folding only; no padding needed).
    w1p, b1p, w2p, b2p = prepare_params(w1, b1, w2, b2)

    out = policy_network_forward(x, w1p, b1p, w2p, b2p)
    jax.block_until_ready(out)

    # Reference check in plain JAX (original, un-folded formulation).
    xn = (x - INPUT_MIN) / (INPUT_MAX - INPUT_MIN)
    h = jnp.maximum(
        jnp.dot(xn, w1, precision=jax.lax.Precision.HIGHEST) + b1, 0.0)
    logits = jnp.dot(h, w2, precision=jax.lax.Precision.HIGHEST) + b2
    ref = jax.nn.log_softmax(logits, axis=-1)
    assert out.shape == (batch, num_actions)
    # Tolerance allows for the in-kernel MXU matmul using default (lower) precision
    # versus the HIGHEST-precision reference.
    assert jnp.allclose(out, ref, atol=5e-3, rtol=5e-3), "mismatch vs reference"

    print("KERNEL_OK")
</pallas_src>

<mosaic_0001>
module attributes {stable_mosaic.version = 11 : i64} {
  func.func @policy_net_kernel(%arg0: i32, %arg1: memref<2x16xf32, #tpu.memory_space<vmem>>, %arg2: memref<16x32xf32, #tpu.memory_space<vmem>>, %arg3: memref<1x32xf32, #tpu.memory_space<vmem>>, %arg4: memref<32x8xf32, #tpu.memory_space<vmem>>, %arg5: memref<1x8xf32, #tpu.memory_space<vmem>>, %arg6: memref<2x8xf32, #tpu.memory_space<vmem>>) attributes {dimension_semantics = [#tpu.dimension_semantics<parallel>], iteration_bounds = array<i64: 1>, scalar_prefetch = 0 : i64, scratch_operands = 0 : i64, tpu.core_type = #tpu.core_type<tc>, window_params = [{transform_indices = @transform_0, window_bounds = array<i64: 2, 16>}, {pipeline_mode = #tpu.pipeline_mode<synchronous>, transform_indices = @transform_1, window_bounds = array<i64: 16, 32>}, {pipeline_mode = #tpu.pipeline_mode<synchronous>, transform_indices = @transform_2, window_bounds = array<i64: 1, 32>}, {pipeline_mode = #tpu.pipeline_mode<synchronous>, transform_indices = @transform_3, window_bounds = array<i64: 32, 8>}, {pipeline_mode = #tpu.pipeline_mode<synchronous>, transform_indices = @transform_4, window_bounds = array<i64: 1, 8>}, {transform_indices = @transform_5, window_bounds = array<i64: 2, 8>}]} {
    %c0 = arith.constant 0 : index
    %c0_0 = arith.constant 0 : index
    %0 = vector.load %arg1[%c0, %c0_0] : memref<2x16xf32, #tpu.memory_space<vmem>>, vector<2x16xf32>
    %c0_1 = arith.constant 0 : index
    %c0_2 = arith.constant 0 : index
    %1 = vector.load %arg2[%c0_1, %c0_2] : memref<16x32xf32, #tpu.memory_space<vmem>>, vector<16x32xf32>
    %cst = arith.constant dense<0.000000e+00> : vector<2x32xf32>
    %2 = tpu.matmul %0, %1, %cst {dimension_numbers = #tpu.dot_dimension_numbers<[1], [0], [0], [1], [0, 0, 1, 1], [], []>} : vector<2x16xf32>, vector<16x32xf32>, vector<2x32xf32> -> vector<2x32xf32>
    %c0_3 = arith.constant 0 : index
    %c0_4 = arith.constant 0 : index
    %3 = vector.load %arg3[%c0_3, %c0_4] : memref<1x32xf32, #tpu.memory_space<vmem>>, vector<1x32xf32>
    %4 = vector.broadcast %3 : vector<1x32xf32> to vector<2x32xf32>
    %5 = arith.addf %2, %4 : vector<2x32xf32>
    %cst_5 = arith.constant 0.000000e+00 : f32
    %6 = vector.broadcast %cst_5 : f32 to vector<2x32xf32>
    %7 = arith.maximumf %5, %6 : vector<2x32xf32>
    %c0_6 = arith.constant 0 : index
    %c0_7 = arith.constant 0 : index
    %8 = vector.load %arg4[%c0_6, %c0_7] : memref<32x8xf32, #tpu.memory_space<vmem>>, vector<32x8xf32>
    %cst_8 = arith.constant dense<0.000000e+00> : vector<2x8xf32>
    %9 = tpu.matmul %7, %8, %cst_8 {dimension_numbers = #tpu.dot_dimension_numbers<[1], [0], [0], [1], [0, 0, 1, 1], [], []>} : vector<2x32xf32>, vector<32x8xf32>, vector<2x8xf32> -> vector<2x8xf32>
    %c0_9 = arith.constant 0 : index
    %c0_10 = arith.constant 0 : index
    %10 = vector.load %arg5[%c0_9, %c0_10] : memref<1x8xf32, #tpu.memory_space<vmem>>, vector<1x8xf32>
    %11 = vector.broadcast %10 : vector<1x8xf32> to vector<2x8xf32>
    %12 = arith.addf %9, %11 : vector<2x8xf32>
    %cst_11 = arith.constant dense<0xFF800000> : vector<2xf32>
    %13 = vector.multi_reduction <maximumf>, %12, %cst_11 [1] : vector<2x8xf32> to vector<2xf32>
    %14 = vector.shape_cast %13 : vector<2xf32> to vector<2x1xf32>
    %15 = vector.broadcast %14 : vector<2x1xf32> to vector<2x8xf32>
    %16 = arith.subf %12, %15 : vector<2x8xf32>
    %17 = math.exp %16 : vector<2x8xf32>
    %cst_12 = arith.constant dense<0.000000e+00> : vector<2xf32>
    %18 = vector.multi_reduction <add>, %17, %cst_12 [1] : vector<2x8xf32> to vector<2xf32>
    %19 = vector.shape_cast %18 : vector<2xf32> to vector<2x1xf32>
    %20 = math.log %19 : vector<2x1xf32>
    %21 = vector.broadcast %20 : vector<2x1xf32> to vector<2x8xf32>
    %22 = arith.subf %16, %21 : vector<2x8xf32>
    %c0_13 = arith.constant 0 : index
    %c0_14 = arith.constant 0 : index
    %23 = vector.load %arg6[%c0_13, %c0_14] : memref<2x8xf32, #tpu.memory_space<vmem>>, vector<2x8xf32>
    tpu.vector_store %arg6[%c0_13, %c0_14], %22 {strides = array<i32>} : memref<2x8xf32, #tpu.memory_space<vmem>>, vector<2x8xf32>,
    return
  }
  func.func @transform_0(%arg0: i32) -> (i32, i32) {
    %c0_i32 = arith.constant 0 : i32
    %c0_i32_0 = arith.constant 0 : i32
    return %arg0, %c0_i32 : i32, i32
  }
  func.func @transform_1(%arg0: i32) -> (i32, i32) {
    %c0_i32 = arith.constant 0 : i32
    %c0_i32_0 = arith.constant 0 : i32
    %c0_i32_1 = arith.constant 0 : i32
    return %c0_i32, %c0_i32_0 : i32, i32
  }
  func.func @transform_2(%arg0: i32) -> (i32, i32) {
    %c0_i32 = arith.constant 0 : i32
    %c0_i32_0 = arith.constant 0 : i32
    %c0_i32_1 = arith.constant 0 : i32
    return %c0_i32, %c0_i32_0 : i32, i32
  }
  func.func @transform_3(%arg0: i32) -> (i32, i32) {
    %c0_i32 = arith.constant 0 : i32
    %c0_i32_0 = arith.constant 0 : i32
    %c0_i32_1 = arith.constant 0 : i32
    return %c0_i32, %c0_i32_0 : i32, i32
  }
  func.func @transform_4(%arg0: i32) -> (i32, i32) {
    %c0_i32 = arith.constant 0 : i32
    %c0_i32_0 = arith.constant 0 : i32
    %c0_i32_1 = arith.constant 0 : i32
    return %c0_i32, %c0_i32_0 : i32, i32
  }
  func.func @transform_5(%arg0: i32) -> (i32, i32) {
    %c0_i32 = arith.constant 0 : i32
    %c0_i32_0 = arith.constant 0 : i32
    return %arg0, %c0_i32 : i32, i32
  }
}

</mosaic_0001>

<bundles_post_ra>
// kernel: policy_network_forward.1
= control target key start
LH: loop header
LB: loop body
LE: loop exit
PB: predicated region body
PF: predicated region fallthrough
CT: control target
= control target key end

     0   :  { %vm28_vm0 = vcmask 130048   ;;  %s214_s0 = inlined_call_operand.vmem [shape: f32[2,16], index: 0, kind: input, shape index: {}]   ;;  %s215_s1 = inlined_call_operand.vmem [shape: f32[16,32], index: 1, kind: input, shape index: {}]   ;;  %s216_s2 = inlined_call_operand.vmem [shape: f32[1,32], index: 2, kind: input, shape index: {}]   ;;  %s217_s3 = inlined_call_operand.vmem [shape: f32[32,8], index: 3, kind: input, shape index: {}]   ;;  %s218_s4 = inlined_call_operand.vmem [shape: f32[1,8], index: 4, kind: input, shape index: {}]   ;;  %s219_s5 = inlined_call_operand.hbm [shape: f32[2,8], index: 5, kind: output, shape index: {}]  }
   0x1   :  { %v23_v0 = vld [vmem:[%s215_s1 + $0x8] sm:$0xff]  ;;  %v22_v1 = vld [vmem:[%s215_s1] sm:$0xff]  ;;  %v56_v3 = vld [vmem:[%s217_s3 + $0x18] sm:$0xff] }
   0x2   :  { %46 = vmatpush.msra.mxu0 %v23_v0  ;;  %v21_v2 = vld [vmem:[%s214_s0] sm:$0x3]  ;;  %77 = vmatpush.msra.mxu1 %v56_v3 }
   0x3   :  { %10 = vsyncpa [#allocation3], 0  ;;  %v55_v4 = vld [vmem:[%s217_s3 + $0x10] sm:$0xff]  ;;  %v54_v5 = vld [vmem:[%s217_s3 + $0x8] sm:$0xff]  ;;  %vm61_vm1 = vcmask 261120   ;;  %vm85_vm2 = vcmask 58368  }
   0x4   :  { %47 = vmatpush.msra.mxu0 %v22_v1  ;;  %78 = vmatpush.msra.mxu1 %v55_v4  ;;  %v53_v6 = vld [vmem:[%s217_s3] sm:$0xff]  ;;  %s106_s10 = sshll.u32 %s219_s5, 4  ;;  %s107_s10 = int_to_ptr.hbm [resolvable:$true] %s106_s10 }
   0x5   :  { %115 = vmatmul.msk.f32.vlgmr.msra.gmra.mxu0 %vm28_vm0, %v21_v2  ;;  %v118_v7 = vld [vmem:[%s216_s2] ss:$0 sm:$0xff]  ;;  %s150_s2 = smov [#allocation2]  }
   0x6   :  { %79 = vmatpush.msra.mxu1 %v54_v5  ;;  %v119_v11 = vld [vmem:[%s218_s4] ss:$0 sm:$0xff]  ;;  %s104_s3 = sshll.u32 %s150_s2, 4  ;;  %s105_s3 = int_to_ptr.vmem [resolvable:$true] %s104_s3 }
   0x8   :  { %80 = vmatpush.msra.mxu1 %v53_v6 }
  0x82   :  { %v49_v8 = vpop.f32.mrf.mxu0 }
  0x83   :  { %v50_v9 = vadd.f32 %v118_v7, %v49_v8 }
  0x85   :  { %v52_v10 = vmax.f32 %v50_v9, 0.0 }
  0x87   :  { %116 = vmatmul.msk.f32.vlgmr.msra.gmra.mxu1 %vm61_vm1, %v52_v10 }
 0x104   :  { %v82_v12 = vpop.f32.mrf.mxu1 }
 0x105   :  { %v83_v13 = vadd.f32 %v119_v11, %v82_v12 }
 0x107   :  { %v86_v14 = vsel %vm85_vm2, %v83_v13, -inf }
 0x108   :  { %87 = vmax.xlane.f32.xlu0 %v86_v14 }
 0x17b   :  { %v88_v15 = vpop.xlane.xlu0 %87 }
 0x17c   :  { %v89_v16 = vsub.f32 %v83_v13, %v88_v15 }
 0x17e   :  { %v90_v17 = vmul.f32 1.442695, %v89_v16 }
 0x180   :  { %120 = vpow2.f32 %v90_v17 }
 0x186   :  { %v121_v18 = vpop.eup %120 }
 0x187   :  { %v92_v19 = vsel %vm85_vm2, %v121_v18, 0.0 }
 0x188   :  { %93 = vadd.xlane.f32.xlu0 %v92_v19 }
 0x1fb   :  { %v94_v20 = vpop.xlane.xlu0 %93 }
 0x1fc   :  { %122 = vlog2.f32 %v94_v20 }
 0x202   :  { %v123_v21 = vpop.eup %122 }
 0x203   :  { %v96_v22 = vmul.f32 0.6931472, %v123_v21 }
 0x205   :  { %v97_v23 = vsub.f32 %v89_v16, %v96_v22 }
 0x207   :  { %98 = vst.msk [vmem:[#allocation2] sm:$0x3] %vm85_vm2, %v97_v23 }
 0x208   :  { %109 = dma.vmem_to_hbm [thread:$0]  %s105_s3, 32, %s107_s10, [#allocation3]  }
 0x209   :  { %148 = dma.done.wait [#allocation3], 32  }
 0x20a   :  { %149 = vsyncadd [#allocation3], 4294967264 }
 0x20b   :  { %114 = vsyncpa [#allocation3], 1 }

</bundles_post_ra>
